<compile_context>
chip_gen: v7x
topology: tpu7x:2x2x1
jax: 0.10.0
libtpu: 0.0.40
codegen_flags: <defaults>
</compile_context>

<pallas_src>
import functools

import jax
import jax.numpy as jnp
from jax.experimental import pallas as pl
from jax.experimental.pallas import tpu as pltpu


def _round_up(a, b):
    return (a + b - 1) // b * b


def _mlp_linear_kernel(x_ref, w1_ref, b1_ref, w2_ref, b2_ref, o_ref):
    # Operands arrive already in the MXU dtype (pre-cast in the wrapper);
    # biases are f32 and are added to the f32 MXU accumulator.
    x = x_ref[...]
    w1 = w1_ref[...]
    w2 = w2_ref[...]
    b1 = b1_ref[...]
    b2 = b2_ref[...]

    def norm_act(h):
        # Per-row L2 normalize over the feature (lane) axis, then LeakyReLU(0.2).
        # rsqrt(max(sum_sq, 1e-24)) == 1 / max(||h||, 1e-12)  (torch F.normalize);
        # the rsqrt runs on the otherwise-idle EUP slot.
        sq = jnp.sum(h * h, axis=-1, keepdims=True)
        inv = jax.lax.rsqrt(jnp.maximum(sq, 1e-24))
        h = h * inv
        return jnp.where(h >= 0, h, 0.2 * h)

    # Layer 1: x @ W1 + b1 -> normalize -> LeakyReLU   (f32 accumulation on MXU)
    h = norm_act(jnp.dot(x, w1, preferred_element_type=jnp.float32) + b1)
    # Layer 2: h @ W2 + b2 -> normalize -> LeakyReLU
    h2 = norm_act(
        jnp.dot(h.astype(w2.dtype), w2, preferred_element_type=jnp.float32) + b2)

    o_ref[...] = h2.astype(o_ref.dtype)


def prepare_mlp_linear_params(w1, b1, w2, b2, *, mxu_dtype=jnp.bfloat16,
                              lane_multiple=128):
    """One-time layout prep (hoisted out of the per-call forward).

    Zero-pads the feature dims to lane-dense multiples of `lane_multiple` and
    casts the matmul operands to the MXU dtype.  Padded weight/bias columns are
    zero, so padded features stay zero and do not affect the per-row L2 norm.
    Biases stay f32.  Weights stored pre-transposed as [fan_in, fan_out].
    """
    in_dim, out_dim = w1.shape
    in_p = _round_up(in_dim, lane_multiple)
    out_p = _round_up(out_dim, lane_multiple)
    w1_p = jnp.pad(w1, ((0, in_p - in_dim), (0, out_p - out_dim))).astype(mxu_dtype)
    w2_p = jnp.pad(w2, ((0, out_p - out_dim), (0, out_p - out_dim))).astype(mxu_dtype)
    b1_p = jnp.pad(b1, ((0, 0), (0, out_p - out_dim))).astype(jnp.float32)
    b2_p = jnp.pad(b2, ((0, 0), (0, out_p - out_dim))).astype(jnp.float32)
    return w1_p, b1_p, w2_p, b2_p


@functools.partial(jax.jit,
                   static_argnames=("out_dim", "tile_rows", "min_grid_steps"))
def mlp_linear_forward(x, w1_p, b1_p, w2_p, b2_p, *, out_dim, tile_rows=256,
                       min_grid_steps=4):
    """x: [N, in_dim]; padded params from prepare_mlp_linear_params().
    Returns [N, out_dim] in x.dtype."""
    n, in_dim = x.shape
    in_p, out_p = w1_p.shape
    mxu_dtype = w1_p.dtype
    out_dtype = x.dtype

    # Per-call work touches only x: cast to the MXU dtype and lane-pad features.
    x_p = x.astype(mxu_dtype)
    if in_p != in_dim:
        x_p = jnp.pad(x_p, ((0, 0), (0, in_p - in_dim)))

    # Row tile: multiple of the sublane pack (16 rows bf16 / 8 rows f32), sized
    # so the grid has >= min_grid_steps steps, capped at tile_rows.  No row
    # padding of x: the ragged tail block is handled by Pallas masked stores.
    sublane = 16 if mxu_dtype.itemsize == 2 else 8
    tile = min(_round_up(tile_rows, sublane),
               max(sublane, _round_up(pl.cdiv(n, min_grid_steps), sublane)))
    grid = (pl.cdiv(n, tile),)

    # Scoped-VMEM estimate (single-buffered weights, double-buffered x/out tiles
    # plus f32 epilogue headroom); raise the limit once it nears v5e's 16 MiB
    # default (v6e/v7x default to 32 MiB).
    itm = mxu_dtype.itemsize
    est_vmem = ((in_p * out_p + out_p * out_p) * itm
                + 2 * out_p * 4
                + 2 * tile * in_p * itm
                + 2 * tile * out_p * jnp.dtype(out_dtype).itemsize
                + 4 * tile * out_p * 4)
    vmem_limit = None
    if est_vmem > 12 * 1024 * 1024:
        vmem_limit = min(96 * 1024 * 1024, 2 * est_vmem)

    out = pl.pallas_call(
        _mlp_linear_kernel,
        out_shape=jax.ShapeDtypeStruct((n, out_p), out_dtype),
        grid_spec=pltpu.PrefetchScalarGridSpec(
            num_scalar_prefetch=0,
            grid=grid,
            in_specs=[
                pl.BlockSpec((tile, in_p), lambda i: (i, 0)),
                # Grid-invariant operands: single-buffered (constant index map,
                # a second buffer would never carry new data).
                pl.BlockSpec((in_p, out_p), lambda i: (0, 0),
                             pipeline_mode=pl.Buffered(1)),
                pl.BlockSpec((1, out_p), lambda i: (0, 0),
                             pipeline_mode=pl.Buffered(1)),
                pl.BlockSpec((out_p, out_p), lambda i: (0, 0),
                             pipeline_mode=pl.Buffered(1)),
                pl.BlockSpec((1, out_p), lambda i: (0, 0),
                             pipeline_mode=pl.Buffered(1)),
            ],
            out_specs=pl.BlockSpec((tile, out_p), lambda i: (i, 0)),
        ),
        compiler_params=pltpu.CompilerParams(
            # "parallel" lets v7x shard row tiles across its 2 TensorCores.
            dimension_semantics=("parallel",),
            vmem_limit_bytes=vmem_limit,
        ),
    )(x_p, w1_p, b1_p, w2_p, b2_p)

    return out[:, :out_dim]


def init_mlp_linear_params(key, in_dim, out_dim, dtype=jnp.float32):
    """Mirrors nn.Linear.reset_parameters(): U(-1/sqrt(fan_in), 1/sqrt(fan_in)).
    Weights stored pre-transposed as [fan_in, fan_out]."""
    k1, k2, k3, k4 = jax.random.split(key, 4)
    bound1 = 1.0 / (in_dim ** 0.5)
    bound2 = 1.0 / (out_dim ** 0.5)
    w1 = jax.random.uniform(k1, (in_dim, out_dim), dtype, -bound1, bound1)
    b1 = jax.random.uniform(k2, (1, out_dim), dtype, -bound1, bound1)
    w2 = jax.random.uniform(k3, (out_dim, out_dim), dtype, -bound2, bound2)
    b2 = jax.random.uniform(k4, (1, out_dim), dtype, -bound2, bound2)
    return w1, b1, w2, b2


def _reference_forward(x, w1, b1, w2, b2):
    """Pure-JAX f32 reference matching the PyTorch module exactly."""
    def norm_act(h):
        nrm = jnp.sqrt(jnp.sum(h * h, axis=1, keepdims=True))
        h = h / jnp.maximum(nrm, 1e-12)
        return jnp.where(h >= 0, h, 0.2 * h)

    h = norm_act(x @ w1 + b1)
    return norm_act(h @ w2 + b2)


if __name__ == "__main__":
    N, in_dim, out_dim = 16, 32, 32  # small shapes consistent with the module

    key = jax.random.PRNGKey(0)
    kx, kp = jax.random.split(key)
    x = jax.random.normal(kx, (N, in_dim), jnp.float32)
    w1, b1, w2, b2 = init_mlp_linear_params(kp, in_dim, out_dim)

    ref = _reference_forward(x, w1, b1, w2, b2)

    # Exact-semantics path: f32 MXU operands (matches the f32 PyTorch module).
    params_f32 = prepare_mlp_linear_params(w1, b1, w2, b2, mxu_dtype=jnp.float32)
    out = jax.block_until_ready(
        mlp_linear_forward(x, *params_f32, out_dim=out_dim))
    assert out.shape == (N, out_dim)
    assert jnp.allclose(out, ref, atol=1e-5, rtol=1e-5), "f32 mismatch vs reference"

    # Fast path recommended for v6e/v7x: bf16 MXU operands, f32 accumulation.
    params_bf16 = prepare_mlp_linear_params(w1, b1, w2, b2, mxu_dtype=jnp.bfloat16)
    out_bf16 = jax.block_until_ready(
        mlp_linear_forward(x, *params_bf16, out_dim=out_dim))
    assert out_bf16.shape == (N, out_dim)
    assert jnp.allclose(out_bf16, ref, atol=3e-2, rtol=3e-2), "bf16 mismatch vs reference"

    # Ragged-N path: last grid block is partial (masked output stores); rows are
    # independent, so tail garbage never reaches surviving rows.
    N2 = 13
    x2 = jax.random.normal(jax.random.PRNGKey(2), (N2, in_dim), jnp.float32)
    ref2 = _reference_forward(x2, w1, b1, w2, b2)
    out2 = jax.block_until_ready(
        mlp_linear_forward(x2, *params_f32, out_dim=out_dim))
    assert out2.shape == (N2, out_dim)
    assert jnp.allclose(out2, ref2, atol=1e-5, rtol=1e-5), "ragged-N mismatch vs reference"

    print("KERNEL_OK")
</pallas_src>

<mosaic_0001>
module attributes {stable_mosaic.version = 11 : i64} {
  func.func @_mlp_linear_kernel(%arg0: i32, %arg1: memref<8x128xf32, #tpu.memory_space<vmem>>, %arg2: memref<128x128xf32, #tpu.memory_space<vmem>>, %arg3: memref<1x128xf32, #tpu.memory_space<vmem>>, %arg4: memref<128x128xf32, #tpu.memory_space<vmem>>, %arg5: memref<1x128xf32, #tpu.memory_space<vmem>>, %arg6: memref<8x128xf32, #tpu.memory_space<vmem>>) attributes {dimension_semantics = [#tpu.dimension_semantics<parallel>], iteration_bounds = array<i64: 2>, scalar_prefetch = 0 : i64, scratch_operands = 0 : i64, tpu.core_type = #tpu.core_type<tc>, window_params = [{transform_indices = @transform_0, window_bounds = array<i64: 8, 128>}, {pipeline_mode = #tpu.pipeline_mode<synchronous>, transform_indices = @transform_1, window_bounds = array<i64: 128, 128>}, {pipeline_mode = #tpu.pipeline_mode<synchronous>, transform_indices = @transform_2, window_bounds = array<i64: 1, 128>}, {pipeline_mode = #tpu.pipeline_mode<synchronous>, transform_indices = @transform_3, window_bounds = array<i64: 128, 128>}, {pipeline_mode = #tpu.pipeline_mode<synchronous>, transform_indices = @transform_4, window_bounds = array<i64: 1, 128>}, {transform_indices = @transform_5, window_bounds = array<i64: 8, 128>}]} {
    %c0 = arith.constant 0 : index
    %c0_0 = arith.constant 0 : index
    %0 = vector.load %arg1[%c0, %c0_0] : memref<8x128xf32, #tpu.memory_space<vmem>>, vector<8x128xf32>
    %c0_1 = arith.constant 0 : index
    %c0_2 = arith.constant 0 : index
    %1 = vector.load %arg2[%c0_1, %c0_2] : memref<128x128xf32, #tpu.memory_space<vmem>>, vector<128x128xf32>
    %c0_3 = arith.constant 0 : index
    %c0_4 = arith.constant 0 : index
    %2 = vector.load %arg4[%c0_3, %c0_4] : memref<128x128xf32, #tpu.memory_space<vmem>>, vector<128x128xf32>
    %c0_5 = arith.constant 0 : index
    %c0_6 = arith.constant 0 : index
    %3 = vector.load %arg3[%c0_5, %c0_6] : memref<1x128xf32, #tpu.memory_space<vmem>>, vector<1x128xf32>
    %c0_7 = arith.constant 0 : index
    %c0_8 = arith.constant 0 : index
    %4 = vector.load %arg5[%c0_7, %c0_8] : memref<1x128xf32, #tpu.memory_space<vmem>>, vector<1x128xf32>
    %cst = arith.constant dense<0.000000e+00> : vector<8x128xf32>
    %5 = tpu.matmul %0, %1, %cst {dimension_numbers = #tpu.dot_dimension_numbers<[1], [0], [0], [1], [0, 0, 1, 1], [], []>} : vector<8x128xf32>, vector<128x128xf32>, vector<8x128xf32> -> vector<8x128xf32>
    %6 = vector.broadcast %3 : vector<1x128xf32> to vector<8x128xf32>
    %7 = arith.addf %5, %6 : vector<8x128xf32>
    %8 = arith.mulf %7, %7 : vector<8x128xf32>
    %cst_9 = arith.constant dense<0.000000e+00> : vector<8xf32>
    %9 = vector.multi_reduction <add>, %8, %cst_9 [1] : vector<8x128xf32> to vector<8xf32>
    %10 = vector.shape_cast %9 : vector<8xf32> to vector<8x1xf32>
    %cst_10 = arith.constant 1.000000e-24 : f32
    %11 = vector.broadcast %cst_10 : f32 to vector<8x1xf32>
    %12 = arith.maximumf %10, %11 : vector<8x1xf32>
    %13 = math.rsqrt %12 : vector<8x1xf32>
    %14 = vector.broadcast %13 : vector<8x1xf32> to vector<8x128xf32>
    %15 = arith.mulf %7, %14 : vector<8x128xf32>
    %cst_11 = arith.constant 0.000000e+00 : f32
    %16 = vector.broadcast %cst_11 : f32 to vector<8x128xf32>
    %17 = arith.cmpf oge, %15, %16 : vector<8x128xf32>
    %cst_12 = arith.constant 2.000000e-01 : f32
    %18 = vector.broadcast %cst_12 : f32 to vector<8x128xf32>
    %19 = arith.mulf %18, %15 : vector<8x128xf32>
    %20 = arith.select %17, %15, %19 : vector<8x128xi1>, vector<8x128xf32>
    %cst_13 = arith.constant dense<0.000000e+00> : vector<8x128xf32>
    %21 = tpu.matmul %20, %2, %cst_13 {dimension_numbers = #tpu.dot_dimension_numbers<[1], [0], [0], [1], [0, 0, 1, 1], [], []>} : vector<8x128xf32>, vector<128x128xf32>, vector<8x128xf32> -> vector<8x128xf32>
    %22 = vector.broadcast %4 : vector<1x128xf32> to vector<8x128xf32>
    %23 = arith.addf %21, %22 : vector<8x128xf32>
    %24 = arith.mulf %23, %23 : vector<8x128xf32>
    %cst_14 = arith.constant dense<0.000000e+00> : vector<8xf32>
    %25 = vector.multi_reduction <add>, %24, %cst_14 [1] : vector<8x128xf32> to vector<8xf32>
    %26 = vector.shape_cast %25 : vector<8xf32> to vector<8x1xf32>
    %cst_15 = arith.constant 1.000000e-24 : f32
    %27 = vector.broadcast %cst_15 : f32 to vector<8x1xf32>
    %28 = arith.maximumf %26, %27 : vector<8x1xf32>
    %29 = math.rsqrt %28 : vector<8x1xf32>
    %30 = vector.broadcast %29 : vector<8x1xf32> to vector<8x128xf32>
    %31 = arith.mulf %23, %30 : vector<8x128xf32>
    %cst_16 = arith.constant 0.000000e+00 : f32
    %32 = vector.broadcast %cst_16 : f32 to vector<8x128xf32>
    %33 = arith.cmpf oge, %31, %32 : vector<8x128xf32>
    %cst_17 = arith.constant 2.000000e-01 : f32
    %34 = vector.broadcast %cst_17 : f32 to vector<8x128xf32>
    %35 = arith.mulf %34, %31 : vector<8x128xf32>
    %36 = arith.select %33, %31, %35 : vector<8x128xi1>, vector<8x128xf32>
    %c0_18 = arith.constant 0 : index
    %c0_19 = arith.constant 0 : index
    %37 = vector.load %arg6[%c0_18, %c0_19] : memref<8x128xf32, #tpu.memory_space<vmem>>, vector<8x128xf32>
    tpu.vector_store %arg6[%c0_18, %c0_19], %36 {strides = array<i32>} : memref<8x128xf32, #tpu.memory_space<vmem>>, vector<8x128xf32>,
    return
  }
  func.func @transform_0(%arg0: i32) -> (i32, i32) {
    %c0_i32 = arith.constant 0 : i32
    %c0_i32_0 = arith.constant 0 : i32
    return %arg0, %c0_i32 : i32, i32
  }
  func.func @transform_1(%arg0: i32) -> (i32, i32) {
    %c0_i32 = arith.constant 0 : i32
    %c0_i32_0 = arith.constant 0 : i32
    %c0_i32_1 = arith.constant 0 : i32
    return %c0_i32, %c0_i32_0 : i32, i32
  }
  func.func @transform_2(%arg0: i32) -> (i32, i32) {
    %c0_i32 = arith.constant 0 : i32
    %c0_i32_0 = arith.constant 0 : i32
    %c0_i32_1 = arith.constant 0 : i32
    return %c0_i32, %c0_i32_0 : i32, i32
  }
  func.func @transform_3(%arg0: i32) -> (i32, i32) {
    %c0_i32 = arith.constant 0 : i32
    %c0_i32_0 = arith.constant 0 : i32
    %c0_i32_1 = arith.constant 0 : i32
    return %c0_i32, %c0_i32_0 : i32, i32
  }
  func.func @transform_4(%arg0: i32) -> (i32, i32) {
    %c0_i32 = arith.constant 0 : i32
    %c0_i32_0 = arith.constant 0 : i32
    %c0_i32_1 = arith.constant 0 : i32
    return %c0_i32, %c0_i32_0 : i32, i32
  }
  func.func @transform_5(%arg0: i32) -> (i32, i32) {
    %c0_i32 = arith.constant 0 : i32
    %c0_i32_0 = arith.constant 0 : i32
    return %arg0, %c0_i32 : i32, i32
  }
}

</mosaic_0001>

<bundles_post_ra>
// kernel: mlp_linear_forward.1
= control target key start
LH: loop header
LB: loop body
LE: loop exit
PB: predicated region body
PF: predicated region fallthrough
CT: control target
= control target key end

     0   :  { %10 = vsyncpa [#allocation3], 0  ;;  %s1148_s0 = inlined_call_operand.vmem [shape: f32[16,128], index: 0, kind: input, shape index: {}]   ;;  %s1149_s1 = inlined_call_operand.hbm [shape: f32[128,128], index: 1, kind: input, shape index: {}]   ;;  %s1150_s2 = inlined_call_operand.vmem [shape: f32[1,128], index: 2, kind: input, shape index: {}]   ;;  %s1151_s3 = inlined_call_operand.hbm [shape: f32[128,128], index: 3, kind: input, shape index: {}]   ;;  %s1152_s4 = inlined_call_operand.vmem [shape: f32[1,128], index: 4, kind: input, shape index: {}]   ;;  %s1153_s5 = inlined_call_operand.hbm [shape: f32[16,128], index: 5, kind: output, shape index: {}]  }
   0x1   :  { %11 = vsyncpa [#allocation6], 0 }
   0x2   :  { %12 = vsyncpa [#allocation4], 0 }
   0x3   :  { %14 = vsyncpa [#allocation4 + $0x1], 0  ;;  %s954_s18 = smov 0   ;;  %s956_s19 = smov 0  }
   0x4   :  { %s958_s20 = smov 0   ;;  %s960_s21 = smov 0  }
   0x5 LB: > { %s975_s22 = sadd.s32 4294967295, %s914_s21   ;;  %s551_s23 = sadd.s32 4294967294, %s914_s21   ;;  %s914_s21 = sphi %s960_s21, %s1171_s21   ;;  %s910_s20 = sphi %s958_s20, %s1170_s20   ;;  %s906_s19 = sphi %s956_s19, %s1169_s19   ;;  %s902_s18 = sphi %s954_s18, %s1168_s18  }
   0x6   : > { %s979_s24 = sadd.s32 1, %s914_s21   ;;  %s137_s25 = sadd.s32 1, %s910_s20 }
   0x7   : > { %s134_s26 = ssub.s32 %s914_s21, %s979_s24  ;;  %p147_p0 = scmp.ne.s32.totalorder %s910_s20, %s906_s19 }
   0x8   : > { %p135_p1 = scmp.eq.s32.totalorder %s134_s26, 0  ;;  %p148_p2 = scmp.eq.s32.totalorder %s975_s22, 1 }
   0x9   : > { %p153_p3 = scmp.ne.s32.totalorder %s906_s19, %s902_s18  ;;  %p154_p4 = scmp.eq.s32.totalorder %s551_s23, 1 }
   0xa   : > { %s990_s27 = scalar_select %p135_p1, %s910_s20, %s137_s25  }
   0xb   : > { %p992_p5 = por %p148_p2, %p147_p0  ;;  %p996_p6 = por %p154_p4, %p153_p3 }
   0xc   : > { %p552_p7 = scmp.ge.s32.totalorder %s914_s21, 1  ;;  %p161_p8 = scmp.lt.s32.totalorder %s914_s21, 3 }
   0xd   : > { %s1157_s28 = scalar_select %p992_p5, 1, 0 }
   0xe   : > { %s1158_s29 = scalar_select %p996_p6, 1, 0 }
   0xf   : > { %p1154_p9 = scmp.eq.s32.totalorder %s975_s22, 0  ;;  %p1003_p10 = pnand %p552_p7, %p161_p8 }
  0x10   : > { %s916_s6 = smov [#allocation2]   ;;  %s917_s9 = smov [#allocation5]  }
  0x11   : > { %s1159_s30 = scalar_select %p1003_p10, 1, 0 }
  0x12   : > { %s173_s7 = sshll.u32 %s916_s6, 4  ;;  %p729_p11 = pneg %p1003_p10  ;;  %s174_s7 = int_to_ptr.vmem [resolvable:$true] %s173_s7 }
  0x13   : > { %s189_s10 = sshll.u32 %s917_s9, 4  ;;  %s788_s13 = scalar_lea.hbm %s1149_s1, 2048  ;;  %s1015_s10 = int_to_ptr.vmem [resolvable:$true] %s189_s10 }
  0x14   : > { %p1011_p12 = pnand %p1154_p9, %p729_p11  ;;  %p789_p13 = scmp.ne.s32.totalorder %s1149_s1, %s788_s13 }
  0x15   : > { %p795_p3 = scmp.lt.u32.totalorder %s788_s13, %s1149_s1 }
  0x16   : > { %p790_p0 = pneg %p1011_p12 }
  0x18   : > { %p791_p1 = pnand %p790_p0, %p789_p13 }
  0x1a   : > { %p792_p2 = pneg %p791_p1 }
  0x1c   : > { %p797_p4 = pnand %p795_p3, %p792_p2 }
  0x1e   : > { %800 = shalt.err (!%p797_p4)
}
  0x1f   : > { %s801_s23 = scalar_lea.vmem %s174_s7, 2048  ;;  %p809_p9 = scmp.lt.s32.totalorder %s174_s7, %s174_s7 }
  0x20   : > { %p802_p7 = scmp.ne.s32.totalorder %s174_s7, %s801_s23  ;;  %p810_p6 = scmp.lt.s32.totalorder %s801_s23, %s801_s23 }
  0x22   : > { %p804_p8 = pnand %p802_p7, %p790_p0  ;;  %p811_p5 = por %p810_p6, %p809_p9 }
  0x24   : > { %p805_p11 = pneg %p804_p8 }
  0x26   : > { %p812_p10 = pnand %p811_p5, %p805_p11 }
  0x28   : > { %815 = shalt.err (!%p812_p10)
}
  0x29   : > { %s918_s25 = smov 128   ;;  %s919_s26 = smov 8  }
  0x2a   : > { %732 = dma.hbm_to_vmem [thread:$0]  (!%p1011_p12), %s1149_s1, 2048, %s174_s7, [#allocation3], %s918_s25, %s918_s25, %s919_s26  }
  0x2b   : > { %s816_s13 = scalar_lea.hbm %s1151_s3, 2048 }
  0x2c   : > { %p817_p13 = scmp.ne.s32.totalorder %s1151_s3, %s816_s13  ;;  %p823_p9 = scmp.lt.u32.totalorder %s816_s13, %s1151_s3 }
  0x2e   : > { %p819_p5 = pnand %p817_p13, %p790_p0 }
  0x30   : > { %p820_p6 = pneg %p819_p5 }
  0x32   : > { %p825_p10 = pnand %p823_p9, %p820_p6 }
  0x34   : > { %828 = shalt.err (!%p825_p10)
}
  0x35   : > { %s829_s7 = scalar_lea.vmem %s1015_s10, 2048  ;;  %p837_p4 = scmp.lt.s32.totalorder %s1015_s10, %s1015_s10 }
  0x36   : > { %p830_p1 = scmp.ne.s32.totalorder %s1015_s10, %s829_s7  ;;  %p838_p7 = scmp.lt.s32.totalorder %s829_s7, %s829_s7 }
  0x38   : > { %p832_p2 = pnand %p830_p1, %p790_p0  ;;  %p839_p8 = por %p838_p7, %p837_p4 }
  0x3a   : > { %p833_p3 = pneg %p832_p2 }
  0x3c   : > { %p840_p11 = pnand %p839_p8, %p833_p3 }
  0x3e   : > { %843 = shalt.err (!%p840_p11)
}
  0x3f   : > { %735 = dma.hbm_to_vmem [thread:$0]  (!%p1011_p12), %s1151_s3, 2048, %s1015_s10, [#allocation6], %s918_s25, %s918_s25, %s919_s26  }
  0x40   : > { %p1161_p13 = scmp.ne.s32.totalorder %s1159_s30, 0 }
  0x41   : > { %p1162_p5 = scmp.eq.s32.totalorder (!%p1161_p13), %s975_s22, 0 }
  0x42   : > { %215 = sbr.rel (%p1161_p13) target bundleno = 879 (0x36f), region = 40 }
  0x49   : > { %889 = dma.done.wait (%p1162_p5), [#allocation3], 2048   ;;  %p1163_p0 = pmov %p1162_p5 }
  0x4b   : > { %891 = vsyncadd (%p1163_p0), [#allocation3], 4294965248  ;;  %p1164_p6 = pmov %p1163_p0 }
  0x4c   : > { %p1165_p9 = pmov %p1163_p0 }
  0x4d   : > { %893 = dma.done.wait (%p1164_p6), [#allocation6], 2048  }
  0x4e   : > { %895 = vsyncadd (%p1165_p9), [#allocation6], 4294965248  ;;  %v920_v0 = vmov 0.0|0.0   ;;  %vm921_vm0 = vmmov 0   ;;  %v922_v1 = vmov 0.0   ;;  %v251_v2 = vld [vmem:[#allocation2] sm:$0xff] }
  0x4f   : > { %671 = vmatprep.subr.bf16.mxu0 %v920_v0  ;;  %633 = vmatprep.mubr.msk.f32.mxu0 %vm921_vm0, %v922_v1  ;;  %v252_v3 = vld [vmem:[#allocation2 + $0x8] sm:$0xff]  ;;  %v253_v4 = vld [vmem:[#allocation2 + $0x10] sm:$0xff]  ;;  %v254_v6 = vld [vmem:[#allocation2 + $0x18] sm:$0xff]  ;;  %p246_p12 = scmp.lt.s32.totalorder %s975_s22, 1  ;;  %s243_s14 = sand.u32 1, %s906_s19  }
  0x50   : > { %695 = vmatprep.subr.bf16.mxu1 %v920_v0  ;;  %668 = vmatprep.mubr.msk.f32.mxu1 %vm921_vm0, %v922_v1  ;;  %v672_v5 = vpack.c.bf16 %v252_v3, %v251_v2  ;;  %v675_v7 = vpack.c.bf16 %v254_v6, %v253_v4  ;;  %v255_v8 = vld [vmem:[#allocation2 + $0x20] sm:$0xff]  ;;  %v256_v9 = vld [vmem:[#allocation2 + $0x28] sm:$0xff]  ;;  %v257_v11 = vld [vmem:[#allocation2 + $0x30] sm:$0xff]  ;;  %s559_s15 = sshll.u32 %s243_s14, 3  ;;  %s564_s16 = sshll.u32 %s975_s22, 7 }
  0x51   : > { %v678_v10 = vpack.c.bf16 %v256_v9, %v255_v8  ;;  %v258_v12 = vld [vmem:[#allocation2 + $0x38] sm:$0xff]  ;;  %v259_v14 = vld [vmem:[#allocation2 + $0x40] sm:$0xff]  ;;  %v260_v15 = vld [vmem:[#allocation2 + $0x48] sm:$0xff]  ;;  %s247_s30 = scalar_select %p246_p12, %s975_s22, 1 }
  0x52   : > { %673 = vmatpush3.bf16.msra.mxu0 %v672_v5  ;;  %v681_v13 = vpack.c.bf16 %v258_v12, %v257_v11  ;;  %v684_v16 = vpack.c.bf16 %v260_v15, %v259_v14  ;;  %v261_v17 = vld [vmem:[#allocation2 + $0x50] sm:$0xff]  ;;  %v262_v18 = vld [vmem:[#allocation2 + $0x58] sm:$0xff]  ;;  %v263_v20 = vld [vmem:[#allocation2 + $0x60] sm:$0xff]  ;;  %s245_s17 = scalar_lea.vmem [#allocation7], %s559_s15  ;;  %p1166_p1 = scmp.ne.s32.totalorder %s1157_s28, 0 }
  0x53   : > { %674 = vmatprep.subr.bf16.mxu0 %v920_v0  ;;  %v687_v19 = vpack.c.bf16 %v262_v18, %v261_v17  ;;  %v264_v21 = vld [vmem:[#allocation2 + $0x68] sm:$0xff]  ;;  %v265_v23 = vld [vmem:[#allocation2 + $0x70] sm:$0xff]  ;;  %v266_v24 = vld [vmem:[#allocation2 + $0x78] sm:$0xff]  ;;  %s560_s8 = sshll.u32 %s247_s30, 3  ;;  %s470_s7 = sshll.u32 %s245_s17, 4  ;;  %s1108_s7 = int_to_ptr.vmem [resolvable:$true] %s470_s7 }
  0x54   : > { %v690_v22 = vpack.c.bf16 %v264_v21, %v263_v20  ;;  %v693_v25 = vpack.c.bf16 %v266_v24, %v265_v23  ;;  %s249_s26 = scalar_lea.vmem %s1148_s0, %s560_s8  ;;  %v267_v27 = vld [vmem:[#allocation5] sm:$0xff]  ;;  %v268_v28 = vld [vmem:[#allocation5 + $0x8] sm:$0xff]  ;;  %v269_v29 = vld [vmem:[#allocation5 + $0x10] sm:$0xff]  ;;  %s1106_s30 = scalar_lea.hbm %s1153_s5, %s564_s16 }
  0x55   : > { %v250_v26 = vld [vmem:[%s249_s26] sm:$0xff]  ;;  %v696_v30 = vpack.c.bf16 %v268_v28, %v267_v27  ;;  %v270_v31 = vld [vmem:[#allocation5 + $0x18] sm:$0xff]  ;;  %v271_v33 = vld [vmem:[#allocation5 + $0x20] sm:$0xff]  ;;  %s457_s8 = scalar_lea.sflag [#allocation4], %s243_s14  ;;  %s844_s10 = scalar_lea.vmem %s1108_s7, 128 }
  0x56   : > { %676 = vmatpush3.bf16.msra.mxu0 %v675_v7  ;;  %v699_v32 = vpack.c.bf16 %v270_v31, %v269_v29  ;;  %v272_v34 = vld [vmem:[#allocation5 + $0x28] sm:$0xff]  ;;  %v273_v36 = vld [vmem:[#allocation5 + $0x30] sm:$0xff]  ;;  %v274_v37 = vld [vmem:[#allocation5 + $0x38] sm:$0xff]  ;;  %p845_p10 = scmp.ne.s32.totalorder %s1108_s7, %s844_s10  ;;  %s923_s22 = smov [#allocation7]  }
  0x57   : > { %677 = vmatprep.subr.bf16.mxu0 %v920_v0  ;;  %697 = vmatpush3.bf16.msra.mxu1 %v696_v30  ;;  %v702_v35 = vpack.c.bf16 %v272_v34, %v271_v33  ;;  %v705_v38 = vpack.c.bf16 %v274_v37, %v273_v36  ;;  %v561_v39 = vld [vmem:[%s1150_s2] ss:$0 sm:$0xff]  ;;  %v275_v44 = vld [vmem:[#allocation5 + $0x40] sm:$0xff]  ;;  %v276_v45 = vld [vmem:[#allocation5 + $0x48] sm:$0xff]  ;;  %s848_s25 = sshll.u32 %s923_s22, 4  ;;  %s849_s25 = int_to_ptr.vmem [resolvable:$false] %s848_s25 }
  0x58   : > { %698 = vmatprep.subr.bf16.mxu1 %v920_v0  ;;  %v708_v46 = vpack.c.bf16 %v276_v45, %v275_v44  ;;  %v277_v47 = vld [vmem:[#allocation5 + $0x50] sm:$0xff]  ;;  %v278_v48 = vld [vmem:[#allocation5 + $0x58] sm:$0xff]  ;;  %v279_v50 = vld [vmem:[#allocation5 + $0x60] sm:$0xff]  ;;  %p846_p2 = pnand %p845_p10, %p1166_p1  ;;  %s850_s26 = scalar_lea.vmem %s849_s25, 256 }
  0x59   : > { %v711_v49 = vpack.c.bf16 %v278_v48, %v277_v47  ;;  %v280_v51 = vld [vmem:[#allocation5 + $0x68] sm:$0xff]  ;;  %v281_v53 = vld [vmem:[#allocation5 + $0x70] sm:$0xff]  ;;  %v282_v54 = vld [vmem:[#allocation5 + $0x78] sm:$0xff]  ;;  %p851_p4 = scmp.lt.s32.totalorder %s1108_s7, %s849_s25  ;;  %p852_p7 = scmp.lt.s32.totalorder %s850_s26, %s844_s10 }
  0x5a   : > { %679 = vmatpush3.bf16.msra.mxu0 %v678_v10  ;;  %v714_v52 = vpack.c.bf16 %v280_v51, %v279_v50  ;;  %v717_v55 = vpack.c.bf16 %v282_v54, %v281_v53  ;;  %v562_v62 = vld [vmem:[%s1152_s4] ss:$0 sm:$0xff]  ;;  %p847_p3 = pneg %p846_p2 }
  0x5b   : > { %680 = vmatprep.subr.bf16.mxu0 %v920_v0  ;;  %700 = vmatpush3.bf16.msra.mxu1 %v699_v32  ;;  %p853_p8 = por %p852_p7, %p851_p4 }
  0x5c   : > { %701 = vmatprep.subr.bf16.mxu1 %v920_v0 }
  0x5d   : > { %p854_p11 = pnand %p853_p8, %p847_p3 }
  0x5e   : > { %682 = vmatpush3.bf16.msra.mxu0 %v681_v13 }
  0x5f   : > { %683 = vmatprep.subr.bf16.mxu0 %v920_v0  ;;  %703 = vmatpush3.bf16.msra.mxu1 %v702_v35 }
  0x60   : > { %704 = vmatprep.subr.bf16.mxu1 %v920_v0 }
  0x62   : > { %685 = vmatpush3.bf16.msra.mxu0 %v684_v16 }
  0x63   : > { %686 = vmatprep.subr.bf16.mxu0 %v920_v0  ;;  %706 = vmatpush3.bf16.msra.mxu1 %v705_v38 }
  0x64   : > { %707 = vmatprep.subr.bf16.mxu1 %v920_v0 }
  0x66   : > { %688 = vmatpush3.bf16.msra.mxu0 %v687_v19 }
  0x67   : > { %689 = vmatprep.subr.bf16.mxu0 %v920_v0  ;;  %709 = vmatpush3.bf16.msra.mxu1 %v708_v46 }
  0x68   : > { %710 = vmatprep.subr.bf16.mxu1 %v920_v0 }
  0x6a   : > { %691 = vmatpush3.bf16.msra.mxu0 %v690_v22 }
  0x6b   : > { %692 = vmatprep.subr.bf16.mxu0 %v920_v0  ;;  %712 = vmatpush3.bf16.msra.mxu1 %v711_v49 }
  0x6c   : > { %713 = vmatprep.subr.bf16.mxu1 %v920_v0 }
  0x6e   : > { %694 = vmatpush3.bf16.msra.mxu0 %v693_v25 }
  0x6f   : > { %715 = vmatpush3.bf16.msra.mxu1 %v714_v52 }
  0x70   : > { %716 = vmatprep.subr.bf16.mxu1 %v920_v0 }
  0x71   : > { %634 = vmatmul.mubr.f32.vlgmr.msra.gmra.mrb[0].mxu0 %v250_v26 }
  0x73   : > { %718 = vmatpush3.bf16.msra.mxu1 %v717_v55 }
 0x144   : > { %v357_v40 = vpop.f32.mrb[0].mxu0 }
 0x145   : > { %v358_v41 = vadd.f32 %v561_v39, %v357_v40  ;;  %v635_v42 = vpop.f32.mrb[1].mxu0 }
 0x147   : > { %v361_v43 = vmul.f32 %v358_v41, %v358_v41 }
 0x149   : > { %362 = vadd.xlane.f32.xlu0 %v361_v43 }
 0x1d6   : > { %v363_v56 = vpop.xlane.xlu0 %362 }
 0x1d7   : > { %v364_v57 = vmax.f32 %v363_v56, 1e-24 }
 0x1d9   : > { %784 = vrsqrt.f32 %v364_v57 }
 0x1e3   : > { %v785_v58 = vpop.eup %784 }
 0x1e4   : > { %v366_v59 = vmul.f32 %v785_v58, %v358_v41 }
 0x1e6   : > { %vm367_vm1 = vcmp.ge.f32.partialorder %v366_v59, 0.0  ;;  %v368_v60 = vmul.f32 0.2, %v366_v59 }
 0x1e8   : > { %v369_v61 = vsel %vm367_vm1, %v366_v59, %v368_v60 }
 0x1e9   : > { %669 = vmatmul.mubr.f32.vlgmr.msra.gmra.mrb[0].mxu1 %v369_v61 }
 0x2bc   : > { %v442_v63 = vpop.f32.mrb[0].mxu1 }
 0x2bd   : > { %v443_v1 = vadd.f32 %v562_v62, %v442_v63  ;;  %v670_v2 = vpop.f32.mrb[1].mxu1 }
 0x2bf   : > { %v446_v0 = vmul.f32 %v443_v1, %v443_v1 }
 0x2c1   : > { %447 = vadd.xlane.f32.xlu0 %v446_v0 }
 0x34e   : > { %v448_v3 = vpop.xlane.xlu0 %447 }
 0x34f   : > { %v449_v4 = vmax.f32 %v448_v3, 1e-24 }
 0x351   : > { %786 = vrsqrt.f32 %v449_v4 }
 0x35b   : > { %v787_v5 = vpop.eup %786 }
 0x35c   : > { %v451_v6 = vmul.f32 %v787_v5, %v443_v1 }
 0x35e   : > { %vm452_vm2 = vcmp.ge.f32.partialorder %v451_v6, 0.0  ;;  %v453_v7 = vmul.f32 0.2, %v451_v6 }
 0x360   : > { %v454_v8 = vsel %vm452_vm2, %v451_v6, %v453_v7 }
 0x361   : > { %455 = vst [vmem:[%s245_s17] sm:$0xff] %v454_v8 }
 0x362   : > { %857 = shalt.err (!%p854_p11)
}
 0x363   : > { %s858_s9 = scalar_lea.hbm %s1106_s30, 128  ;;  %s862_s13 = scalar_lea.hbm %s1153_s5, 256 }
 0x364   : > { %p859_p13 = scmp.ne.s32.totalorder %s1106_s30, %s858_s9  ;;  %p863_p6 = scmp.lt.u32.totalorder %s1106_s30, %s1153_s5 }
 0x365   : > { %p864_p9 = scmp.lt.u32.totalorder %s862_s13, %s858_s9  ;;  %p866_p10 = scmp.lt.u32.totalorder %s858_s9, %s1106_s30 }
 0x366   : > { %p860_p5 = pnand %p859_p13, %p1166_p1 }
 0x367   : > { %p865_p12 = por %p864_p9, %p863_p6 }
 0x368   : > { %p861_p0 = pneg %p860_p5 }
 0x369   : > { %p867_p2 = por %p866_p10, %p865_p12 }
 0x36b   : > { %p868_p3 = pnand %p867_p2, %p861_p0 }
 0x36d   : > { %871 = shalt.err (!%p868_p3)
}
 0x36e   : > { %727 = dma.vmem_to_hbm [thread:$0]  (%p1166_p1), %s1108_s7, 128, %s1106_s30, %s457_s8  }
 0x36f PF: > { %p744_p4 = scmp.ge.s32.totalorder %s914_s21, 2  ;;  %s482_s16 = sand.u32 1, %s902_s18  }
 0x370   : > { %p1167_p7 = scmp.ne.s32.totalorder %s1158_s29, 0  ;;  %s483_s17 = scalar_lea.sflag [#allocation4], %s482_s16 }
 0x372   : > { %p737_p8 = pnand %p744_p4, %p1167_p7 }
 0x374   : > { %897 = dma.done.wait (!%p737_p8), %s483_s17, 128  }
 0x375   : > { %899 = vsyncadd (!%p737_p8), %s483_s17, 4294967168  ;;  %p17_p11 = scmp.ge.s32.totalorder %s979_s24, 4   ;;  %s1168_s18 = smov %s906_s19 }
 0x376   : > { %s1169_s19 = smov %s910_s20  ;;  %s1170_s20 = smov %s990_s27 }
 0x377   : > { %s1171_s21 = smov %s979_s24  ;;  %19 = sbr.rel (!%p17_p11) target bundleno = 5 (0x5), region = 84 }
 0x37e   :  { %488 = vsyncpa [#allocation3], 1 }
 0x37f   :  { %490 = vsyncpa [#allocation3 + $0x1], 1 }
 0x380   :  { %491 = vsyncpa [#allocation6], 1 }
 0x381   :  { %492 = vsyncpa [#allocation4], 1 }
 0x382   :  { %494 = vsyncpa [#allocation4 + $0x1], 1 }

</bundles_post_ra>
